<compile_context>
chip_gen: v5e
topology: v5e:2x2
jax: 0.10.0
libtpu: 0.0.40
codegen_flags: <defaults>
</compile_context>

<pallas_src>
import jax
import jax.numpy as jnp
from jax.experimental import pallas as pl
from jax.experimental.pallas import tpu as pltpu


def _pos_enc_kernel(x_ref, w_ref, pb_ref, o_ref):
    # x_ref:  (1, C, S)  one batch element, channels-first; lane axis = S (dense)
    # w_ref:  (F, C)     projection weights for the feature channels
    # pb_ref: (F, S)     precomputed positional bias table: Wp @ pos + bias (f32)
    # o_ref:  (1, F, S)  channels-first output; lane axis = S (dense, unmasked stores)
    acc = jnp.dot(w_ref[...], x_ref[0], preferred_element_type=jnp.float32)  # (F, S)
    o_ref[0] = (acc + pb_ref[...]).astype(o_ref.dtype)


def positional_encoding_forward(x_nchw, weight, bias):
    """x_nchw: (B, n_kernels, H, W); weight: (n_features, n_kernels+2); bias: (n_features,).
    Returns (H*W, B, n_features), matching the PyTorch module."""
    B, C, H, W = x_nchw.shape
    F_out, C_in = weight.shape
    assert C_in == C + 2
    S = H * W

    # free reshape (contiguous NCHW), no HBM transpose
    x_bcs = x_nchw.reshape(B, C, S)

    # positional channels: channel 0 depends on h (linspace over H), channel 1 on w
    # (linspace over W); s = h*W + w, identical to torch's .view flattening.
    x_lin = jnp.linspace(-1.0, 1.0, H, dtype=jnp.float32)
    y_lin = jnp.linspace(-1.0, 1.0, W, dtype=jnp.float32)
    pos_sc = jnp.stack(
        [jnp.broadcast_to(x_lin[:, None], (H, W)).reshape(S),
         jnp.broadcast_to(y_lin[None, :], (H, W)).reshape(S)],
        axis=0,
    )  # (2, S)

    # fold positional projection + bias into an (F, S) table (input-independent)
    w_fc = weight[:, :C].astype(x_bcs.dtype)                       # (F, C)
    w_fp = weight[:, C:].astype(jnp.float32)                       # (F, 2)
    pos_bias = w_fp @ pos_sc + bias.astype(jnp.float32)[:, None]   # (F, S)

    out_dtype = x_bcs.dtype

    out_bfs = pl.pallas_call(
        _pos_enc_kernel,
        out_shape=jax.ShapeDtypeStruct((B, F_out, S), out_dtype),
        grid_spec=pltpu.PrefetchScalarGridSpec(
            num_scalar_prefetch=0,
            grid=(B,),
            in_specs=[
                pl.BlockSpec((1, C, S), lambda b: (b, 0, 0)),
                pl.BlockSpec((F_out, C), lambda b: (0, 0)),
                pl.BlockSpec((F_out, S), lambda b: (0, 0)),
            ],
            out_specs=pl.BlockSpec((1, F_out, S), lambda b: (b, 0, 0)),
        ),
        compiler_params=pltpu.CompilerParams(
            dimension_semantics=("parallel",)),
    )(x_bcs, w_fc, pos_bias)

    # glue: (B, F, S) -> (S, B, F) to match the PyTorch module's output convention
    return jnp.transpose(out_bfs, (2, 0, 1))


if __name__ == "__main__":
    key = jax.random.PRNGKey(0)
    B, C, H, W, F_out = 2, 4, 16, 16, 32
    k1, k2, k3 = jax.random.split(key, 3)

    x = jax.random.normal(k1, (B, C, H, W), dtype=jnp.float32)
    # deterministic Linear(n_kernels+2, n_features) init (uniform, nn.Linear-style bound)
    bound = 1.0 / float(jnp.sqrt(jnp.float32(C + 2)))
    weight = jax.random.uniform(k2, (F_out, C + 2), minval=-bound, maxval=bound,
                                dtype=jnp.float32)
    bias = jax.random.uniform(k3, (F_out,), minval=-bound, maxval=bound,
                              dtype=jnp.float32)

    out = positional_encoding_forward(x, weight, bias)
    out = jax.block_until_ready(out)

    # pure-JAX reference of the exact PyTorch forward
    S = H * W
    x_lin = jnp.linspace(-1.0, 1.0, H, dtype=jnp.float32)
    y_lin = jnp.linspace(-1.0, 1.0, W, dtype=jnp.float32)
    xx = jnp.broadcast_to(x_lin[:, None], (H, W))[None, None, :, :].repeat(B, axis=0)
    yy = jnp.broadcast_to(y_lin[None, :], (H, W))[None, None, :, :].repeat(B, axis=0)
    xcat = jnp.concatenate([x, xx, yy], axis=1)              # (B, C+2, H, W)
    flat = xcat.reshape(B, C + 2, S).transpose(0, 2, 1)       # (B, S, C+2)
    ref = (flat @ weight.T + bias).transpose(1, 0, 2)         # (S, B, F)

    assert out.shape == (S, B, F_out), out.shape
    assert jnp.allclose(out, ref, atol=1e-5, rtol=1e-5), \
        float(jnp.max(jnp.abs(out - ref)))
    print("KERNEL_OK")
</pallas_src>

<mosaic_0001>
module attributes {stable_mosaic.version = 11 : i64} {
  func.func @_pos_enc_kernel(%arg0: i32, %arg1: memref<1x4x256xf32, #tpu.memory_space<vmem>>, %arg2: memref<32x4xf32, #tpu.memory_space<vmem>>, %arg3: memref<32x256xf32, #tpu.memory_space<vmem>>, %arg4: memref<1x32x256xf32, #tpu.memory_space<vmem>>) attributes {dimension_semantics = [#tpu.dimension_semantics<parallel>], iteration_bounds = array<i64: 2>, scalar_prefetch = 0 : i64, scratch_operands = 0 : i64, tpu.core_type = #tpu.core_type<tc>, window_params = [{transform_indices = @transform_0, window_bounds = array<i64: 1, 4, 256>}, {pipeline_mode = #tpu.pipeline_mode<synchronous>, transform_indices = @transform_1, window_bounds = array<i64: 32, 4>}, {pipeline_mode = #tpu.pipeline_mode<synchronous>, transform_indices = @transform_2, window_bounds = array<i64: 32, 256>}, {transform_indices = @transform_3, window_bounds = array<i64: 1, 32, 256>}]} {
    %c0 = arith.constant 0 : index
    %c0_0 = arith.constant 0 : index
    %0 = vector.load %arg2[%c0, %c0_0] : memref<32x4xf32, #tpu.memory_space<vmem>>, vector<32x4xf32>
    %c0_1 = arith.constant 0 : index
    %c0_2 = arith.constant 0 : index
    %c0_3 = arith.constant 0 : index
    %1 = vector.load %arg1[%c0_1, %c0_2, %c0_3] : memref<1x4x256xf32, #tpu.memory_space<vmem>>, vector<1x4x256xf32>
    %2 = vector.shape_cast %1 : vector<1x4x256xf32> to vector<4x256xf32>
    %cst = arith.constant dense<0.000000e+00> : vector<32x256xf32>
    %3 = tpu.matmul %0, %2, %cst {dimension_numbers = #tpu.dot_dimension_numbers<[1], [0], [0], [1], [0, 0, 1, 1], [], []>} : vector<32x4xf32>, vector<4x256xf32>, vector<32x256xf32> -> vector<32x256xf32>
    %c0_4 = arith.constant 0 : index
    %c0_5 = arith.constant 0 : index
    %4 = vector.load %arg3[%c0_4, %c0_5] : memref<32x256xf32, #tpu.memory_space<vmem>>, vector<32x256xf32>
    %5 = arith.addf %3, %4 : vector<32x256xf32>
    %c0_6 = arith.constant 0 : index
    %c0_7 = arith.constant 0 : index
    %c0_8 = arith.constant 0 : index
    %6 = vector.load %arg4[%c0_6, %c0_7, %c0_8] : memref<1x32x256xf32, #tpu.memory_space<vmem>>, vector<1x32x256xf32>
    %7 = vector.shape_cast %6 : vector<1x32x256xf32> to vector<32x256xf32>
    %8 = vector.shape_cast %5 : vector<32x256xf32> to vector<1x32x256xf32>
    tpu.vector_store %arg4[%c0_6, %c0_7, %c0_8], %8 {strides = array<i32>} : memref<1x32x256xf32, #tpu.memory_space<vmem>>, vector<1x32x256xf32>,
    return
  }
  func.func @transform_0(%arg0: i32) -> (i32, i32, i32) {
    %c0_i32 = arith.constant 0 : i32
    %c0_i32_0 = arith.constant 0 : i32
    %c0_i32_1 = arith.constant 0 : i32
    return %arg0, %c0_i32, %c0_i32_0 : i32, i32, i32
  }
  func.func @transform_1(%arg0: i32) -> (i32, i32) {
    %c0_i32 = arith.constant 0 : i32
    %c0_i32_0 = arith.constant 0 : i32
    %c0_i32_1 = arith.constant 0 : i32
    return %c0_i32, %c0_i32_0 : i32, i32
  }
  func.func @transform_2(%arg0: i32) -> (i32, i32) {
    %c0_i32 = arith.constant 0 : i32
    %c0_i32_0 = arith.constant 0 : i32
    %c0_i32_1 = arith.constant 0 : i32
    return %c0_i32, %c0_i32_0 : i32, i32
  }
  func.func @transform_3(%arg0: i32) -> (i32, i32, i32) {
    %c0_i32 = arith.constant 0 : i32
    %c0_i32_0 = arith.constant 0 : i32
    %c0_i32_1 = arith.constant 0 : i32
    return %arg0, %c0_i32, %c0_i32_0 : i32, i32, i32
  }
}

</mosaic_0001>

<bundles_post_ra>
// kernel: tpu_custom_call.1
= control target key start
LH: loop header
LB: loop body
LE: loop exit
PB: predicated region body
PF: predicated region fallthrough
CT: control target
= control target key end

     0   :  { %8 = vsyncpa [#allocation3], 0  ;;  %s701_s0 = inlined_call_operand.vmem [shape: f32[2,4,256], index: 0, kind: input, shape index: {}]   ;;  %s702_s1 = inlined_call_operand.vmem [shape: f32[32,4], index: 1, kind: input, shape index: {}]   ;;  %s703_s2 = inlined_call_operand.hbm [shape: f32[32,256], index: 2, kind: input, shape index: {}]   ;;  %s704_s3 = inlined_call_operand.hbm [shape: f32[2,32,256], index: 3, kind: output, shape index: {}]  }
   0x1   :  { %9 = vsyncpa [#allocation4], 0 }
   0x2   :  { %11 = vsyncpa [#allocation4 + $0x1], 0  ;;  %s582_s12 = smov 0   ;;  %s584_s13 = smov 0  }
   0x3   :  { %s586_s14 = smov 0   ;;  %s588_s15 = smov 0  }
   0x4 LB: > { %s603_s16 = sadd.s32 4294967295, %s555_s15   ;;  %s377_s17 = sadd.s32 4294967294, %s555_s15   ;;  %s555_s15 = sphi %s588_s15, %s710_s15   ;;  %s551_s14 = sphi %s586_s14, %s709_s14   ;;  %s547_s13 = sphi %s584_s13, %s708_s13   ;;  %s543_s12 = sphi %s582_s12, %s707_s12  }
   0x5   : > { %s607_s18 = sadd.s32 1, %s555_s15   ;;  %s92_s19 = sadd.s32 1, %s551_s14 }
   0x6   : > { %s89_s20 = ssub.s32 %s555_s15, %s607_s18  ;;  %p102_p0 = scmp.ne.s32.totalorder %s551_s14, %s547_s13 }
   0x7   : > { %p90_p1 = scmp.eq.s32.totalorder %s89_s20, 0  ;;  %p103_p2 = scmp.eq.s32.totalorder %s603_s16, 1 }
   0x8   : > { %p108_p3 = scmp.ne.s32.totalorder %s547_s13, %s543_s12  ;;  %p109_p4 = scmp.eq.s32.totalorder %s377_s17, 1 }
   0x9   : > { %s618_s21 = scalar_select %p90_p1, %s551_s14, %s92_s19  }
   0xa   : > { %p620_p5 = por %p103_p2, %p102_p0  ;;  %p624_p6 = por %p109_p4, %p108_p3 }
   0xb   : > { %p378_p7 = scmp.ge.s32.totalorder %s555_s15, 1  ;;  %p116_p8 = scmp.lt.s32.totalorder %s555_s15, 3 }
   0xc   : > { %p419_p9 = scmp.eq.s32.totalorder %s603_s16, 0  ;;  %s130_s26 = sshll.u32 %s703_s2, 4  ;;  %s131_s26 = int_to_ptr.hbm [resolvable:$true] %s130_s26 }
   0xd   : > { %p117_p10 = pnand %p378_p7, %p116_p8  ;;  %s557_s27 = smov [#allocation2]  }
   0xe   : > { %s132_s28 = sshll.u32 %s557_s27, 4  ;;  %s558_s29 = smov 256   ;;  %s133_s28 = int_to_ptr.vmem [resolvable:$true] %s132_s28 }
   0xf   : > { %p411_p11 = pneg %p117_p10  ;;  %s559_s30 = smov 16  }
  0x10   : > { %156 = sbr.rel (%p117_p10) target bundleno = 185 (0xb9), region = 32 }
  0x11   : > { %p412_p12 = pnand %p419_p9, %p411_p11 }
  0x13   : > { %414 = dma.hbm_to_vmem [thread:$0]  (!%p412_p12), %s131_s26, 1024, %s133_s28, [#allocation3], %s558_s29, %s558_s29, %s559_s30  }
  0x15   : > { %534 = dma.done.wait (%p419_p9), [#allocation3], 1024  }
  0x16   : > { %536 = vsyncadd (%p419_p9), [#allocation3], 4294966272  ;;  %p181_p13 = scmp.lt.s32.totalorder %s603_s16, 1  ;;  %vm216_vm0 = vcmask 1043456   ;;  %v188_v1 = vld [vmem:[%s702_s1 + $0x10] sm:$0xff]  ;;  %vm203_vm1 = vcmask 31744  }
  0x17   : > { %v186_v4 = vld [vmem:[%s702_s1] sm:$0xff]  ;;  %v189_v5 = vld [vmem:[%s702_s1 + $0x18] sm:$0xff]  ;;  %v187_v6 = vld [vmem:[%s702_s1 + $0x8] sm:$0xff]  ;;  %s178_s26 = sand.u32 1, %s547_s13   ;;  %s402_s29 = sshll.u32 %s603_s16, 6 }
  0x18   : > { %s182_s4 = scalar_select %p181_p13, %s603_s16, 1  ;;  %v191_v7 = vld [vmem:[#allocation2] sm:$0xff]  ;;  %v192_v8 = vld [vmem:[#allocation2 + $0x8] sm:$0xff]  ;;  %v193_v19 = vld [vmem:[#allocation2 + $0x10] sm:$0xff] }
  0x19   : > { %s383_s27 = sshll.u32 %s178_s26, 6  ;;  %v195_v13 = vld [vmem:[#allocation2 + $0x20] sm:$0xff]  ;;  %v196_v14 = vld [vmem:[#allocation2 + $0x28] sm:$0xff]  ;;  %v194_v20 = vld [vmem:[#allocation2 + $0x18] sm:$0xff]  ;;  %s288_s16 = scalar_lea.sflag [#allocation4], %s178_s26 }
  0x1a   : > { %s401_s5 = sshll.u32 %s182_s4, 3  ;;  %s180_s28 = scalar_lea.vmem [#allocation5], %s383_s27  ;;  %v197_v25 = vld [vmem:[#allocation2 + $0x30] sm:$0xff]  ;;  %v198_v26 = vld [vmem:[#allocation2 + $0x38] sm:$0xff] }
  0x1b   : > { %s185_s8 = scalar_lea.vmem %s701_s0, %s401_s5  ;;  %s299_s5 = scalar_lea.hbm %s704_s3, %s402_s29 }
  0x1c   : > { %v190_v0 = vld [vmem:[%s185_s8] sm:$0xff]  ;;  %s300_s6 = sshll.u32 %s180_s28, 4  ;;  %s302_s7 = sshll.u32 %s299_s5, 4  ;;  %s301_s6 = int_to_ptr.vmem [resolvable:$true] %s300_s6  ;;  %s303_s7 = int_to_ptr.hbm [resolvable:$true] %s302_s7 }
  0x1d   : > { %200 = vst [vmem:[#allocation1] ss:$2 sm:$0xff] %v190_v0  ;;  %s503_s8 = sshra.s32 %s303_s7, 4  ;;  %s509_s17 = scalar_lea.hbm %s704_s3, 128  ;;  %s504_s8 = int_to_ptr.hbm [resolvable:$true] %s503_s8 }
  0x1e   : > { %s505_s9 = scalar_lea.hbm %s504_s8, 64  ;;  %p510_p3 = scmp.lt.s32.totalorder %s504_s8, %s704_s3 }
  0x1f   : > { %p506_p0 = scmp.ne.s32.totalorder %s504_s8, %s505_s9  ;;  %p511_p4 = scmp.lt.s32.totalorder %s509_s17, %s505_s9 }
  0x21   : > { %p507_p1 = pnand %p506_p0, %p620_p5  ;;  %p512_p7 = por %p511_p4, %p510_p3 }
  0x23   : > { %p508_p2 = pneg %p507_p1 }
  0x24   : > { %v201_v2 = vld.sshfl [vmem:[#allocation1] sm:$0xff pattern:$0x75316420]  ;;  %v202_v3 = vld.sshfl [vmem:[#allocation1 + $0x8] sm:$0xff pattern:$0x75316420] }
  0x25   : > { %403 = vmatpush.msk.msra.mxu2 %vm216_vm0, %v201_v2  ;;  %404 = vmatpush.msk.msra.mxu3 %vm216_vm0, %v202_v3  ;;  %p513_p8 = pnand %p512_p7, %p508_p2 }
  0x26   : > { %389 = vmatmul.msk.f32.vlgmr.msra.gmra.mxu2 %vm203_vm1, %v188_v1  ;;  %394 = vmatmul.msk.f32.vlgmr.msra.gmra.mxu3 %vm203_vm1, %v188_v1 }
  0x27   : > { %386 = vmatpush.msk.msra.mxu0 %vm216_vm0, %v201_v2  ;;  %391 = vmatpush.msk.msra.mxu1 %vm216_vm0, %v202_v3 }
  0x28   : > { %387 = vmatmul.msk.f32.vlgmr.msra.gmra.mxu0 %vm203_vm1, %v186_v4  ;;  %392 = vmatmul.msk.f32.vlgmr.msra.gmra.mxu1 %vm203_vm1, %v186_v4 }
  0x2e   : > { %390 = vmatmul.msk.f32.gmra.mxu2 %vm203_vm1, %v189_v5  ;;  %395 = vmatmul.msk.f32.gmra.mxu3 %vm203_vm1, %v189_v5 }
  0x30   : > { %388 = vmatmul.msk.f32.gmra.mxu0 %vm203_vm1, %v187_v6  ;;  %393 = vmatmul.msk.f32.gmra.mxu1 %vm203_vm1, %v187_v6 }
  0xa5   : > { %v238_v9 = vpop.f32.mrf.mxu0  ;;  %v267_v10 = vpop.f32.mrf.mxu1 }
  0xa6   : > { %v239_v11 = vadd.f32 %v238_v9, %v191_v7  ;;  %v268_v12 = vadd.f32 %v267_v10, %v192_v8 }
  0xa8   : > { %279 = vst [vmem:[%s180_s28] sm:$0xff] %v239_v11 }
  0xa9   : > { %v244_v15 = vpop.f32.mrf.mxu2  ;;  %280 = vst [vmem:[%s180_s28 + $0x8] sm:$0xff] %v268_v12  ;;  %v273_v16 = vpop.f32.mrf.mxu3 }
  0xaa   : > { %v245_v17 = vadd.f32 %v244_v15, %v195_v13  ;;  %v274_v18 = vadd.f32 %v273_v16, %v196_v14 }
  0xac   : > { %283 = vst [vmem:[%s180_s28 + $0x20] sm:$0xff] %v245_v17 }
  0xad   : > { %284 = vst [vmem:[%s180_s28 + $0x28] sm:$0xff] %v274_v18  ;;  %v241_v21 = vpop.f32.mrf.mxu0  ;;  %v270_v22 = vpop.f32.mrf.mxu1 }
  0xae   : > { %v242_v23 = vadd.f32 %v241_v21, %v193_v19  ;;  %v271_v24 = vadd.f32 %v270_v22, %v194_v20 }
  0xb0   : > { %281 = vst [vmem:[%s180_s28 + $0x10] sm:$0xff] %v242_v23 }
  0xb1   : > { %v247_v27 = vpop.f32.mrf.mxu2  ;;  %282 = vst [vmem:[%s180_s28 + $0x18] sm:$0xff] %v271_v24  ;;  %v276_v28 = vpop.f32.mrf.mxu3 }
  0xb2   : > { %v248_v29 = vadd.f32 %v247_v27, %v197_v25  ;;  %v277_v30 = vadd.f32 %v276_v28, %v198_v26 }
  0xb4   : > { %285 = vst [vmem:[%s180_s28 + $0x30] sm:$0xff] %v248_v29 }
  0xb5   : > { %286 = vst [vmem:[%s180_s28 + $0x38] sm:$0xff] %v277_v30 }
  0xb6   : > { %516 = shalt.err (!%p513_p8)
}
  0xb7   : > { %s560_s24 = smov 256   ;;  %s561_s25 = smov 16  }
  0xb8   : > { %409 = dma.vmem_to_hbm [thread:$0]  (%p620_p5), %s301_s6, 1024, %s303_s7, %s288_s16, %s560_s24, %s560_s24, %s561_s25  }
  0xb9 PF: > { %p421_p9 = scmp.ge.s32.totalorder %s555_s15, 2  ;;  %s317_s26 = sand.u32 1, %s543_s12  }
  0xba   : > { %s318_s27 = scalar_lea.sflag [#allocation4], %s317_s26 }
  0xbb   : > { %p416_p10 = pnand %p421_p9, %p624_p6 }
  0xbd   : > { %p417_p11 = pneg %p416_p10 }
  0xbf   : > { %538 = dma.done.wait (%p417_p11), %s318_s27, 1024  }
  0xc0   : > { %540 = vsyncadd (%p417_p11), %s318_s27, 4294966272  ;;  %p14_p12 = scmp.ge.s32.totalorder %s607_s18, 4   ;;  %s707_s12 = smov %s547_s13 }
  0xc1   : > { %s708_s13 = smov %s551_s14  ;;  %s709_s14 = smov %s618_s21 }
  0xc2   : > { %s710_s15 = smov %s607_s18  ;;  %16 = sbr.rel (!%p14_p12) target bundleno = 4 (0x4), region = 72 }
  0xc7   :  { %324 = vsyncpa [#allocation3], 1 }
  0xc8   :  { %326 = vsyncpa [#allocation3 + $0x1], 1 }
  0xc9   :  { %327 = vsyncpa [#allocation4], 1 }
  0xca   :  { %329 = vsyncpa [#allocation4 + $0x1], 1 }

</bundles_post_ra>
